<compile_context>
chip_gen: v7x
topology: tpu7x:2x2x1
jax: 0.10.0
libtpu: 0.0.40
codegen_flags: <defaults>
</compile_context>

<pallas_src>
import functools

import jax
import jax.numpy as jnp
from jax import lax
from jax.experimental import pallas as pl
from jax.experimental.pallas import tpu as pltpu


def _adaptive_fm_kernel(x_ref, w_ref, o_ref, *, K, H, W, HWp, compute_dtype,
                        residual_folded):
    """One grid step: one batch element, Cb channels, full (padded) spatial.

    x_ref, o_ref: (Cb, HWp) VMEM — spatial flattened, lane-dense.
    w_ref:        (Cb, K*K + 1) VMEM — per-channel [folded taps..., gamma*bias].
    """
    KK = K * K
    p = (K - 1) // 2
    HW = H * W

    xf = x_ref[...].astype(compute_dtype)            # (Cb, HWp)
    w = w_ref[...]                                   # (Cb, KK+1), compute_dtype
    zero = jnp.zeros((), compute_dtype)

    # Hoisted boundary predicates: (1, HWp) vectors, amortized over Cb sublanes.
    flat = lax.broadcasted_iota(jnp.int32, (1, HWp), 1)
    col = flat % W

    # --- column pass: K column-shifted + column-masked variants, built once ----
    colvars = {0: xf}
    for oj in range(-p, p + 1):
        if oj == 0:
            continue
        v = pltpu.roll(xf, shift=(-oj) % HWp, axis=1)   # v[i] == xf[(i + oj) % HWp]
        cmask = (col < W - oj) if oj > 0 else (col >= -oj)
        colvars[oj] = jnp.where(cmask, v, zero)

    # --- row pass: per-row-offset partial sums, one row roll + row mask each ----
    out = None
    for oi in range(-p, p + 1):
        rowsum = None
        for oj in range(-p, p + 1):
            t = (oi + p) * K + (oj + p)
            term = w[:, t:t + 1] * colvars[oj]          # scalar-broadcast FMA pair
            rowsum = term if rowsum is None else rowsum + term
        if oi != 0:
            rowsum = pltpu.roll(rowsum, shift=(-(oi * W)) % HWp, axis=1)
            rmask = (flat < HW - oi * W) if oi > 0 else (flat >= (-oi) * W)
            rowsum = jnp.where(rmask, rowsum, zero)
        out = rowsum if out is None else out + rowsum

    # gamma*bias column; the "+ x" residual is already folded into the center tap
    # for f32 compute (added explicitly for bf16 to preserve accuracy).
    res = out + w[:, KK:KK + 1]
    if not residual_folded:
        res = res + xf
    o_ref[...] = res.astype(o_ref.dtype)


_TILE_TARGET_BYTES = 2 << 20    # ~2 MiB x-tiles: measured sweet spot on all gens
_TILE_HARD_CAP_BYTES = 4 << 20  # beyond this, dbuf I/O + temps risk v7x's 64 MiB
_VMEM_LIMIT_BYTES = 48 << 20    # explicit scoped-VMEM limit, safe on v5e/v6e/v7x


def _pick_channel_block(N, C, per_channel_bytes):
    """Channel block size: multiple of 8 (or the full C), tile <= ~2 MiB, and
    prefer >= 4 grid steps so both v7x TensorCores run and the pipeline has
    something to double-buffer.  Fails loudly instead of silently overflowing
    VMEM on huge spatial shapes."""
    cands = [C] + [cb for cb in range(8, C, 8) if C % cb == 0]
    fitting = [cb for cb in cands if cb * per_channel_bytes <= _TILE_TARGET_BYTES]
    pool = fitting if fitting else [min(cands)]
    if min(pool) * per_channel_bytes > _TILE_HARD_CAP_BYTES:
        # TODO(synk): add an H-axis split with a p-row halo for very large H*W.
        raise ValueError(
            "adaptive_fm: smallest legal channel block "
            f"({min(pool)} ch x {per_channel_bytes} B = "
            f"{min(pool) * per_channel_bytes} B) exceeds the VMEM tile budget; "
            "spatial (H) blocking is not implemented.")
    multi = [cb for cb in pool if N * (C // cb) >= 4]
    return max(multi) if multi else max(pool)


def adaptive_fm(x, weight, bias, gamma, kernel_size):
    """x: (N, C, H, W); weight: (C, 1, K, K); bias: (C,); gamma: (1,)."""
    N, C, H, W = x.shape
    K = kernel_size
    # PyTorch padding=(K-1)//2 gives 'same' output only for odd K.
    assert K % 2 == 1, "AdaptiveFM Pallas kernel requires odd kernel_size"
    assert weight.shape == (C, 1, K, K)
    HW = H * W
    HWp = 128 * pl.cdiv(HW, 128)    # lane-dense flattened spatial

    # bf16 inputs stay in bf16 on the VPU (v6e/v7x); everything else in f32.
    compute_dtype = jnp.bfloat16 if x.dtype == jnp.bfloat16 else jnp.float32
    residual_folded = compute_dtype == jnp.float32

    # Fold gamma into the tiny filter/bias (wrapper-side, negligible work); for
    # f32 compute also fold the "+ x" residual into the center tap; append
    # gamma*bias as an extra filter column so one operand carries everything.
    g = gamma.reshape(()).astype(jnp.float32)
    w_taps = weight.reshape(C, K * K).astype(jnp.float32) * g
    if residual_folded:
        center = ((K - 1) // 2) * K + (K - 1) // 2
        w_taps = w_taps.at[:, center].add(1.0)
    w_aug = jnp.concatenate(
        [w_taps, (bias.astype(jnp.float32) * g)[:, None]],
        axis=1).astype(compute_dtype)                        # (C, K*K + 1)

    x_flat = x.reshape(N, C, HW)                             # contiguous: free
    if HWp != HW:
        # One extra XLA pad pass, but keeps pltpu.roll + unmasked full-width vst
        # (lane-dense stores were the biggest measured lever).  Pad lanes never
        # feed real outputs: every shifted read of a real output lane is either
        # in-range or zeroed by the row/column masks.
        x_flat = jnp.pad(x_flat, ((0, 0), (0, 0), (0, HWp - HW)))

    Cb = _pick_channel_block(N, C, HWp * x.dtype.itemsize)

    kernel = functools.partial(
        _adaptive_fm_kernel, K=K, H=H, W=W, HWp=HWp,
        compute_dtype=compute_dtype, residual_folded=residual_folded)

    out_flat = pl.pallas_call(
        kernel,
        out_shape=jax.ShapeDtypeStruct((N, C, HWp), x.dtype),
        grid=(C // Cb, N),
        in_specs=[
            pl.BlockSpec((None, Cb, HWp), lambda cb, n: (n, cb, 0)),
            pl.BlockSpec((Cb, K * K + 1), lambda cb, n: (cb, 0)),
        ],
        out_specs=pl.BlockSpec((None, Cb, HWp), lambda cb, n: (n, cb, 0)),
        compiler_params=pltpu.CompilerParams(
            dimension_semantics=("parallel", "parallel"),
            vmem_limit_bytes=_VMEM_LIMIT_BYTES),
    )(x_flat, w_aug)

    if HWp != HW:
        out_flat = out_flat[:, :, :HW]
    return out_flat.reshape(N, C, H, W)


def adaptive_fm_reference(x, weight, bias, gamma):
    """Pure-JAX reference matching the PyTorch forward."""
    N, C, H, W = x.shape
    K = weight.shape[-1]
    p = (K - 1) // 2
    y = lax.conv_general_dilated(
        x.astype(jnp.float32),
        weight.astype(jnp.float32),
        window_strides=(1, 1),
        padding=[(p, p), (p, p)],
        feature_group_count=C,
        dimension_numbers=("NCHW", "OIHW", "NCHW"),
    )
    y = y + bias.reshape(1, C, 1, 1)
    return y * gamma.reshape(()) + x.astype(jnp.float32)


if __name__ == "__main__":
    N, C, H, W = 2, 4, 16, 16
    K = 3

    key = jax.random.PRNGKey(0)
    kx, kw, kb = jax.random.split(key, 3)

    x = jax.random.normal(kx, (N, C, H, W), dtype=jnp.float32)
    # Conv2d(in=C, out=C, k, groups=C) -> weight (C, 1, K, K), bias (C,)
    weight = jax.random.normal(kw, (C, 1, K, K), dtype=jnp.float32) * 0.1
    bias = jax.random.normal(kb, (C,), dtype=jnp.float32) * 0.1
    # Module initializes gamma to zeros(1); use a nonzero deterministic value so
    # the conv path is actually exercised by the check.
    gamma = jnp.array([0.5], dtype=jnp.float32)

    out = adaptive_fm(x, weight, bias, gamma, K)
    out = jax.block_until_ready(out)

    ref = adaptive_fm_reference(x, weight, bias, gamma)
    assert out.shape == (N, C, H, W)
    assert jnp.allclose(out, ref, atol=1e-5, rtol=1e-5), (
        f"max abs err {jnp.max(jnp.abs(out - ref))}")

    print("KERNEL_OK")
</pallas_src>

<mosaic_0001>
module attributes {stable_mosaic.version = 11 : i64} {
  func.func @_adaptive_fm_kernel(%arg0: i32, %arg1: i32, %arg2: memref<1x4x256xf32, #tpu.memory_space<vmem>>, %arg3: memref<4x10xf32, #tpu.memory_space<vmem>>, %arg4: memref<1x4x256xf32, #tpu.memory_space<vmem>>) attributes {dimension_semantics = [#tpu.dimension_semantics<parallel>, #tpu.dimension_semantics<parallel>], iteration_bounds = array<i64: 1, 2>, scalar_prefetch = 0 : i64, scratch_operands = 0 : i64, tpu.core_type = #tpu.core_type<tc>, window_params = [{transform_indices = @transform_0, window_bounds = array<i64: 1, 4, 256>}, {transform_indices = @transform_1, window_bounds = array<i64: 4, 10>}, {transform_indices = @transform_2, window_bounds = array<i64: 1, 4, 256>}]} {
    %c0 = arith.constant 0 : index
    %c0_0 = arith.constant 0 : index
    %c0_1 = arith.constant 0 : index
    %0 = vector.load %arg2[%c0, %c0_0, %c0_1] : memref<1x4x256xf32, #tpu.memory_space<vmem>>, vector<1x4x256xf32>
    %1 = vector.shape_cast %0 : vector<1x4x256xf32> to vector<4x256xf32>
    %c0_2 = arith.constant 0 : index
    %c0_3 = arith.constant 0 : index
    %2 = vector.load %arg3[%c0_2, %c0_3] : memref<4x10xf32, #tpu.memory_space<vmem>>, vector<4x10xf32>
    %3 = tpu.iota {dimensions = array<i32: 1>} : vector<1x256xi32>
    %c16_i32 = arith.constant 16 : i32
    %c0_i32 = arith.constant 0 : i32
    %4 = arith.cmpi eq, %c16_i32, %c0_i32 : i32
    %c1_i32 = arith.constant 1 : i32
    %5 = arith.select %4, %c1_i32, %c16_i32 : i32
    %6 = vector.broadcast %5 : i32 to vector<1x256xi32>
    %7 = arith.remsi %3, %6 : vector<1x256xi32>
    %c0_i32_4 = arith.constant 0 : i32
    %8 = vector.broadcast %c0_i32_4 : i32 to vector<1x256xi32>
    %9 = arith.cmpi ne, %7, %8 : vector<1x256xi32>
    %c0_i32_5 = arith.constant 0 : i32
    %10 = vector.broadcast %c0_i32_5 : i32 to vector<1x256xi32>
    %11 = arith.cmpi slt, %7, %10 : vector<1x256xi32>
    %c0_i32_6 = arith.constant 0 : i32
    %12 = arith.cmpi slt, %5, %c0_i32_6 : i32
    %13 = vector.broadcast %12 : i1 to vector<1x256xi1>
    %14 = vector.broadcast %13 : vector<1x256xi1> to vector<1x256xi1>
    %15 = arith.xori %11, %14 : vector<1x256xi1>
    %16 = arith.andi %15, %9 : vector<1x256xi1>
    %17 = vector.broadcast %5 : i32 to vector<1x256xi32>
    %18 = arith.addi %7, %17 : vector<1x256xi32>
    %19 = arith.select %16, %18, %7 : vector<1x256xi1>, vector<1x256xi32>
    %c1_i32_7 = arith.constant 1 : i32
    %20 = tpu.dynamic_rotate %1 by %c1_i32_7 dim 1 : vector<4x256xf32>, i32 -> vector<4x256xf32>
    %c1_i32_8 = arith.constant 1 : i32
    %21 = vector.broadcast %c1_i32_8 : i32 to vector<1x256xi32>
    %22 = arith.cmpi sge, %19, %21 : vector<1x256xi32>
    %cst = arith.constant 0.000000e+00 : f32
    %23 = vector.shape_cast %22 : vector<1x256xi1> to vector<1x256xi1>
    %24 = vector.broadcast %23 : vector<1x256xi1> to vector<4x256xi1>
    %25 = vector.broadcast %cst : f32 to vector<4x256xf32>
    %26 = arith.select %24, %20, %25 : vector<4x256xi1>, vector<4x256xf32>
    %c255_i32 = arith.constant 255 : i32
    %27 = tpu.dynamic_rotate %1 by %c255_i32 dim 1 : vector<4x256xf32>, i32 -> vector<4x256xf32>
    %c15_i32 = arith.constant 15 : i32
    %28 = vector.broadcast %c15_i32 : i32 to vector<1x256xi32>
    %29 = arith.cmpi slt, %19, %28 : vector<1x256xi32>
    %cst_9 = arith.constant 0.000000e+00 : f32
    %30 = vector.shape_cast %29 : vector<1x256xi1> to vector<1x256xi1>
    %31 = vector.broadcast %30 : vector<1x256xi1> to vector<4x256xi1>
    %32 = vector.broadcast %cst_9 : f32 to vector<4x256xf32>
    %33 = arith.select %31, %27, %32 : vector<4x256xi1>, vector<4x256xf32>
    %34 = vector.extract_strided_slice %2 {offsets = [0, 0], sizes = [4, 1], strides = [1, 1]} : vector<4x10xf32> to vector<4x1xf32>
    %35 = vector.broadcast %34 : vector<4x1xf32> to vector<4x256xf32>
    %36 = arith.mulf %35, %26 : vector<4x256xf32>
    %37 = vector.extract_strided_slice %2 {offsets = [0, 1], sizes = [4, 1], strides = [1, 1]} : vector<4x10xf32> to vector<4x1xf32>
    %38 = vector.broadcast %37 : vector<4x1xf32> to vector<4x256xf32>
    %39 = arith.mulf %38, %1 : vector<4x256xf32>
    %40 = arith.addf %36, %39 : vector<4x256xf32>
    %41 = vector.extract_strided_slice %2 {offsets = [0, 2], sizes = [4, 1], strides = [1, 1]} : vector<4x10xf32> to vector<4x1xf32>
    %42 = vector.broadcast %41 : vector<4x1xf32> to vector<4x256xf32>
    %43 = arith.mulf %42, %33 : vector<4x256xf32>
    %44 = arith.addf %40, %43 : vector<4x256xf32>
    %c16_i32_10 = arith.constant 16 : i32
    %45 = tpu.dynamic_rotate %44 by %c16_i32_10 dim 1 : vector<4x256xf32>, i32 -> vector<4x256xf32>
    %c16_i32_11 = arith.constant 16 : i32
    %46 = vector.broadcast %c16_i32_11 : i32 to vector<1x256xi32>
    %47 = arith.cmpi sge, %3, %46 : vector<1x256xi32>
    %cst_12 = arith.constant 0.000000e+00 : f32
    %48 = vector.shape_cast %47 : vector<1x256xi1> to vector<1x256xi1>
    %49 = vector.broadcast %48 : vector<1x256xi1> to vector<4x256xi1>
    %50 = vector.broadcast %cst_12 : f32 to vector<4x256xf32>
    %51 = arith.select %49, %45, %50 : vector<4x256xi1>, vector<4x256xf32>
    %52 = vector.extract_strided_slice %2 {offsets = [0, 3], sizes = [4, 1], strides = [1, 1]} : vector<4x10xf32> to vector<4x1xf32>
    %53 = vector.broadcast %52 : vector<4x1xf32> to vector<4x256xf32>
    %54 = arith.mulf %53, %26 : vector<4x256xf32>
    %55 = vector.extract_strided_slice %2 {offsets = [0, 4], sizes = [4, 1], strides = [1, 1]} : vector<4x10xf32> to vector<4x1xf32>
    %56 = vector.broadcast %55 : vector<4x1xf32> to vector<4x256xf32>
    %57 = arith.mulf %56, %1 : vector<4x256xf32>
    %58 = arith.addf %54, %57 : vector<4x256xf32>
    %59 = vector.extract_strided_slice %2 {offsets = [0, 5], sizes = [4, 1], strides = [1, 1]} : vector<4x10xf32> to vector<4x1xf32>
    %60 = vector.broadcast %59 : vector<4x1xf32> to vector<4x256xf32>
    %61 = arith.mulf %60, %33 : vector<4x256xf32>
    %62 = arith.addf %58, %61 : vector<4x256xf32>
    %63 = arith.addf %51, %62 : vector<4x256xf32>
    %64 = vector.extract_strided_slice %2 {offsets = [0, 6], sizes = [4, 1], strides = [1, 1]} : vector<4x10xf32> to vector<4x1xf32>
    %65 = vector.broadcast %64 : vector<4x1xf32> to vector<4x256xf32>
    %66 = arith.mulf %65, %26 : vector<4x256xf32>
    %67 = vector.extract_strided_slice %2 {offsets = [0, 7], sizes = [4, 1], strides = [1, 1]} : vector<4x10xf32> to vector<4x1xf32>
    %68 = vector.broadcast %67 : vector<4x1xf32> to vector<4x256xf32>
    %69 = arith.mulf %68, %1 : vector<4x256xf32>
    %70 = arith.addf %66, %69 : vector<4x256xf32>
    %71 = vector.extract_strided_slice %2 {offsets = [0, 8], sizes = [4, 1], strides = [1, 1]} : vector<4x10xf32> to vector<4x1xf32>
    %72 = vector.broadcast %71 : vector<4x1xf32> to vector<4x256xf32>
    %73 = arith.mulf %72, %33 : vector<4x256xf32>
    %74 = arith.addf %70, %73 : vector<4x256xf32>
    %c240_i32 = arith.constant 240 : i32
    %75 = tpu.dynamic_rotate %74 by %c240_i32 dim 1 : vector<4x256xf32>, i32 -> vector<4x256xf32>
    %c240_i32_13 = arith.constant 240 : i32
    %76 = vector.broadcast %c240_i32_13 : i32 to vector<1x256xi32>
    %77 = arith.cmpi slt, %3, %76 : vector<1x256xi32>
    %cst_14 = arith.constant 0.000000e+00 : f32
    %78 = vector.shape_cast %77 : vector<1x256xi1> to vector<1x256xi1>
    %79 = vector.broadcast %78 : vector<1x256xi1> to vector<4x256xi1>
    %80 = vector.broadcast %cst_14 : f32 to vector<4x256xf32>
    %81 = arith.select %79, %75, %80 : vector<4x256xi1>, vector<4x256xf32>
    %82 = arith.addf %63, %81 : vector<4x256xf32>
    %83 = vector.extract_strided_slice %2 {offsets = [0, 9], sizes = [4, 1], strides = [1, 1]} : vector<4x10xf32> to vector<4x1xf32>
    %84 = vector.broadcast %83 : vector<4x1xf32> to vector<4x256xf32>
    %85 = arith.addf %82, %84 : vector<4x256xf32>
    %c0_15 = arith.constant 0 : index
    %c0_16 = arith.constant 0 : index
    %c0_17 = arith.constant 0 : index
    %86 = vector.load %arg4[%c0_15, %c0_16, %c0_17] : memref<1x4x256xf32, #tpu.memory_space<vmem>>, vector<1x4x256xf32>
    %87 = vector.shape_cast %86 : vector<1x4x256xf32> to vector<4x256xf32>
    %88 = vector.shape_cast %85 : vector<4x256xf32> to vector<1x4x256xf32>
    tpu.vector_store %arg4[%c0_15, %c0_16, %c0_17], %88 {strides = array<i32>} : memref<1x4x256xf32, #tpu.memory_space<vmem>>, vector<1x4x256xf32>,
    return
  }
  func.func @transform_0(%arg0: i32, %arg1: i32) -> (i32, i32, i32) {
    %c0_i32 = arith.constant 0 : i32
    %c0_i32_0 = arith.constant 0 : i32
    return %arg1, %arg0, %c0_i32 : i32, i32, i32
  }
  func.func @transform_1(%arg0: i32, %arg1: i32) -> (i32, i32) {
    %c0_i32 = arith.constant 0 : i32
    %c0_i32_0 = arith.constant 0 : i32
    return %arg0, %c0_i32 : i32, i32
  }
  func.func @transform_2(%arg0: i32, %arg1: i32) -> (i32, i32, i32) {
    %c0_i32 = arith.constant 0 : i32
    %c0_i32_0 = arith.constant 0 : i32
    return %arg1, %arg0, %c0_i32 : i32, i32, i32
  }
}

</mosaic_0001>

<bundles_post_ra>
// kernel: tpu_custom_call.1
= control target key start
LH: loop header
LB: loop body
LE: loop exit
PB: predicated region body
PF: predicated region fallthrough
CT: control target
= control target key end

     0   :  { %7 = vsyncpa [#allocation3], 0  ;;  %s1029_s0 = inlined_call_operand.hbm [shape: f32[2,4,256], index: 0, kind: input, shape index: {}]   ;;  %s1030_s1 = inlined_call_operand.hbm [shape: f32[4,10], index: 1, kind: input, shape index: {}]   ;;  %s1031_s2 = inlined_call_operand.hbm [shape: f32[2,4,256], index: 2, kind: output, shape index: {}]  }
   0x1   :  { %9 = vsyncpa [#allocation3 + $0x1], 0 }
   0x2   :  { %10 = vsyncpa [#allocation6], 0 }
   0x3   :  { %11 = vsyncpa [#allocation4], 0 }
   0x4   :  { %13 = vsyncpa [#allocation4 + $0x1], 0  ;;  %s780_s9 = smov 0   ;;  %s782_s10 = smov 0  }
   0x5   :  { %s784_s11 = smov 0   ;;  %s786_s12 = smov 0  }
   0x6   :  { %s788_s13 = smov 0   ;;  %s790_s14 = smov 0  }
   0x7 LB: > { %s485_s15 = sadd.s32 4294967295, %s746_s14   ;;  %s486_s16 = sadd.s32 4294967294, %s746_s14   ;;  %s746_s14 = sphi %s790_s14, %s19_s14   ;;  %s742_s13 = sphi %s788_s13, %s1056_s13   ;;  %s738_s12 = sphi %s786_s12, %s1055_s12   ;;  %s734_s11 = sphi %s784_s11, %s1054_s11   ;;  %s730_s10 = sphi %s782_s10, %s1053_s10   ;;  %s726_s9 = sphi %s780_s9, %s1052_s9  }
   0x8   : > { %p53_p0 = scmp.ne.s32.totalorder %s730_s10, %s726_s9  ;;  %p814_p1 = scmp.eq.s32.totalorder %s485_s15, 0 }
   0x9   : > { %p818_p2 = scmp.eq.s32.totalorder %s485_s15, 1  ;;  %p111_p3 = scmp.eq.s32.totalorder %s486_s16, 1 }
   0xa   : > { %s1036_s17 = scalar_select %p814_p1, 1, 0 }
   0xb   : > { %s1037_s18 = scalar_select %p818_p2, 1, 0 }
   0xc   : > { %p824_p4 = por %p814_p1, %p53_p0  ;;  %p487_p5 = scmp.ge.s32.totalorder %s746_s14, 1 }
   0xd   : > { %p829_p6 = por %p111_p3, %p53_p0  ;;  %p118_p7 = scmp.lt.s32.totalorder %s746_s14, 3 }
   0xe   : > { %s1038_s19 = scalar_select %p824_p4, 1, 0 }
   0xf   : > { %s1039_s20 = scalar_select %p829_p6, 1, 0 }
  0x10   : > { %p834_p8 = pnand %p487_p5, %p118_p7  ;;  %s748_s22 = smov [#allocation5]  }
  0x11   : > { %s133_s23 = sshll.u32 %s748_s22, 4  ;;  %s28_s25 = sadd.s32 1, %s742_s13  ;;  %s134_s23 = int_to_ptr.vmem [resolvable:$true] %s133_s23 }
  0x12   : > { %s1040_s21 = scalar_select %p834_p8, 1, 0 }
  0x13   : > { %p512_p10 = pneg %p834_p8  ;;  %s40_s26 = sadd.s32 1, %s734_s11 }
  0x14   : > { %p849_p12 = scmp.ge.s32.totalorder %s28_s25, 2  ;;  %s602_s30 = scalar_lea.hbm %s1030_s1, 64 }
  0x15   : > { %p843_p11 = pnand %p512_p10, %p814_p1  ;;  %p603_p13 = scmp.ne.s32.totalorder %s1030_s1, %s602_s30 }
  0x16   : > { %s1042_s27 = scalar_select %p849_p12, 1, 0 }
  0x17   : > { %p604_p0 = pneg %p843_p11  ;;  %p609_p7 = scmp.lt.u32.totalorder %s602_s30, %s1030_s1 }
  0x19   : > { %p605_p3 = pnand %p604_p0, %p603_p13 }
  0x1b   : > { %p606_p5 = pneg %p605_p3 }
  0x1d   : > { %p611_p10 = pnand %p609_p7, %p606_p5 }
  0x1f   : > { %614 = shalt.err (!%p611_p10)
}
  0x20   : > { %s615_s7 = scalar_lea.vmem %s134_s23, 64  ;;  %p623_p4 = scmp.lt.s32.totalorder %s134_s23, %s134_s23 }
  0x21   : > { %p616_p9 = scmp.ne.s32.totalorder %s134_s23, %s615_s7  ;;  %p624_p8 = scmp.lt.s32.totalorder %s615_s7, %s615_s7 }
  0x23   : > { %p618_p6 = pnand %p616_p9, %p604_p0  ;;  %p625_p2 = por %p624_p8, %p623_p4 }
  0x25   : > { %p619_p1 = pneg %p618_p6 }
  0x27   : > { %p626_p12 = pnand %p625_p2, %p619_p1 }
  0x29   : > { %629 = shalt.err (!%p626_p12)
}
  0x2a   : > { %515 = dma.hbm_to_vmem [thread:$0]  (!%p843_p11), %s1030_s1, 64, %s134_s23, [#allocation6]  }
  0x2b   : > { %p1043_p4 = scmp.ne.s32.totalorder %s1042_s27, 0  ;;  %p47_p1 = scmp.ne.s32.totalorder %s734_s11, %s730_s10 }
  0x2c   : > { %p48_p2 = scmp.eq.s32.totalorder %s746_s14, 0  ;;  %p525_p6 = scmp.lt.s32.totalorder %s746_s14, 2 }
  0x2d   : > { %s1058_s25 = smov (%p1043_p4, %s28_s25), 0  ;;  %p1044_p12 = scmp.ne.s32.totalorder %s1037_s18, 0 }
  0x2e   : > { %s35_s16 = ssub.s32 %s742_s13, %s1058_s25  ;;  %p49_p9 = por %p48_p2, %p47_p1 }
  0x2f   : > { %p38_p8 = scmp.eq.s32.totalorder %s35_s16, 0  ;;  %p881_p13 = por %p1044_p12, %p47_p1 }
  0x30   : > { %s144_s24 = sand.u32 1, %s734_s11   ;;  %s502_s27 = sshll.u32 %s742_s13, 7 }
  0x31   : > { %s889_s28 = scalar_select %p38_p8, %s734_s11, %s40_s26  }
  0x32   : > { %s490_s23 = sshll.u32 %s144_s24, 3  ;;  %s895_s3 = scalar_lea.hbm %s1029_s0, %s502_s27 }
  0x33   : > { %s148_s18 = scalar_lea.vmem [#allocation2], %s490_s23  ;;  %p899_p11 = pnand %p525_p6, %p49_p9 }
  0x34   : > { %s158_s4 = sshll.u32 %s148_s18, 4  ;;  %s145_s26 = scalar_lea.sflag [#allocation3], %s144_s24  ;;  %s897_s4 = int_to_ptr.vmem [resolvable:$true] %s158_s4 }
  0x35   : > { %s630_s6 = scalar_lea.hbm %s895_s3, 128  ;;  %p632_p3 = pneg %p899_p11 }
  0x36   : > { %p631_p0 = scmp.ne.s32.totalorder %s895_s3, %s630_s6  ;;  %s635_s15 = scalar_lea.hbm %s1029_s0, 256 }
  0x37   : > { %p636_p10 = scmp.lt.u32.totalorder %s895_s3, %s1029_s0  ;;  %p637_p4 = scmp.lt.u32.totalorder %s635_s15, %s630_s6 }
  0x38   : > { %p633_p5 = pnand %p632_p3, %p631_p0  ;;  %p639_p2 = scmp.lt.u32.totalorder %s630_s6, %s895_s3 }
  0x39   : > { %p638_p1 = por %p637_p4, %p636_p10 }
  0x3a   : > { %p634_p7 = pneg %p633_p5 }
  0x3b   : > { %p640_p6 = por %p639_p2, %p638_p1 }
  0x3d   : > { %p641_p8 = pnand %p640_p6, %p634_p7 }
  0x3f   : > { %644 = shalt.err (!%p641_p8)
}
  0x40   : > { %s645_s24 = scalar_lea.vmem %s897_s4, 128  ;;  %s749_s27 = smov [#allocation2]  }
  0x41   : > { %p646_p9 = scmp.ne.s32.totalorder %s897_s4, %s645_s24  ;;  %s650_s29 = sshll.u32 %s749_s27, 4  ;;  %s651_s29 = int_to_ptr.vmem [resolvable:$false] %s650_s29 }
  0x42   : > { %s652_s30 = scalar_lea.vmem %s651_s29, 256  ;;  %p653_p5 = scmp.lt.s32.totalorder %s897_s4, %s651_s29 }
  0x43   : > { %p648_p12 = pnand %p646_p9, %p632_p3  ;;  %p654_p10 = scmp.lt.s32.totalorder %s652_s30, %s645_s24 }
  0x45   : > { %p649_p0 = pneg %p648_p12  ;;  %p655_p4 = por %p654_p10, %p653_p5 }
  0x47   : > { %p656_p1 = pnand %p655_p4, %p649_p0 }
  0x49   : > { %659 = shalt.err (!%p656_p1)
}
  0x4a   : > { %519 = dma.hbm_to_vmem [thread:$0]  (!%p899_p11), %s895_s3, 128, %s897_s4, %s145_s26  }
  0x4b   : > { %p1047_p7 = scmp.ne.s32.totalorder %s1040_s21, 0 }
  0x4c   : > { %s931_s18 = sand.u32 (!%p1047_p7), 1, %s730_s10   ;;  %p1048_p3 = scmp.ne.s32.totalorder (!%p1047_p7), %s1038_s19, 0 }
  0x4d   : > { %167 = sbr.rel (%p1047_p7) target bundleno = 391 (0x187), region = 28  ;;  %s494_s6 = sshll.u32 (!%p1047_p7), %s931_s18, 3 }
  0x4e   : > { %s170_s7 = scalar_lea.sflag (!%p1047_p7), [#allocation3], %s931_s18  ;;  %s173_s8 = scalar_lea.vmem (!%p1047_p7), [#allocation2], %s494_s6 }
  0x54   : > { %713 = dma.done.wait (%p1048_p3), %s170_s7, 128  }
  0x55   : > { %715 = vsyncadd (%p1048_p3), %s170_s7, 4294967168  ;;  %p1049_p11 = scmp.ne.s32.totalorder %s1036_s17, 0 }
  0x57   : > { %717 = dma.done.wait (%p1049_p11), [#allocation6], 64  }
  0x58   : > { %719 = vsyncadd (%p1049_p11), [#allocation6], 4294967232  ;;  %v750_v0 = vmov 2   ;;  %v751_v1 = vmov 0   ;;  %v199_v2 = vld [vmem:[#allocation5] sm:$0xf]  ;;  %v200_v14 = vlaneseq }
  0x59   : > { %593 = vset.pattern.permute.xlu1 %v750_v0  ;;  %591 = vset.pattern.permute.xlu0 %v751_v1  ;;  %v752_v3 = vmov 6   ;;  %v753_v4 = vmov 1   ;;  %v754_v5 = vmov 7   ;;  %v755_v6 = vmov 8   ;;  %v945_v7 = vld [vmem:[%s173_s8] sm:$0xff]  ;;  %s756_s17 = smov 1  }
  0x5a   : > { %276 = vperm.xlu1 %593, %v199_v2   ;;  %262 = vperm.xlu0 %591, %v199_v2   ;;  %s757_s19 = smov 127   ;;  %v951_v8 = vcombine.high %v945_v7, %v945_v7  ;;  %v758_v9 = vmov 3   ;;  %v759_v10 = vmov 4   ;;  %v760_v11 = vmov 9   ;;  %s762_s21 = smov 112  }
  0x5b   : > { %v761_v12 = vmov 5   ;;  %v955_v17 = vand.u32 127, %v200_v14  ;;  %s763_s3 = smov 16   ;;  %s503_s4 = sshll.u32 %s738_s12, 7 }
  0x5c   : > { %s197_s5 = scalar_lea.vmem [#allocation7], %s494_s6  ;;  %s980_s23 = scalar_lea.hbm %s1031_s2, %s503_s4 }
  0x5d   : > { %v958_v20 = vadd.s32 128, %v955_v17  ;;  %v207_v21 = vand.u32 15, %v955_v17  ;;  %vm234_vm0 = vcmp.lt.s32.totalorder %v955_v17, 1  ;;  %vm249_vm3 = vcmp.lt.s32.totalorder %v955_v17, 127  ;;  %s389_s26 = sshll.u32 %s197_s5, 4  ;;  %s373_s24 = scalar_lea.sflag [#allocation4], %s931_s18  ;;  %s982_s26 = int_to_ptr.vmem [resolvable:$true] %s389_s26 }
  0x5e   : > { %594 = vset.pattern.permute.xlu1 %v752_v3  ;;  %592 = vset.pattern.permute.xlu0 %v753_v4  ;;  %vm287_vm6 = vcmp.lt.s32.totalorder %v955_v17, 16  ;;  %vm290_vm7 = vcmp.ge.s32.totalorder %v955_v17, 16  ;;  %vm348_vm8 = vcmp.lt.s32.totalorder %v955_v17, 112  ;;  %s660_s27 = scalar_lea.vmem %s982_s26, 128  ;;  %s764_s12 = smov [#allocation7]  }
  0x5f   : > { %323 = vperm.xlu1 %594, %v199_v2   ;;  %268 = vperm.xlu0 %592, %v199_v2   ;;  %v214_v23 = vand.u32 15, %v958_v20  ;;  %vm237_vm1 = vcmp.ge.s32.totalorder %v207_v21, 1  ;;  %vm252_vm4 = vcmp.lt.s32.totalorder %v207_v21, 15  ;;  %vm352_vm9 = vcmp.lt.s32.totalorder %v958_v20, 240  ;;  %p661_p2 = scmp.ne.s32.totalorder %s982_s26, %s660_s27  ;;  %s664_s29 = sshll.u32 %s764_s12, 4  ;;  %s665_s29 = int_to_ptr.vmem [resolvable:$false] %s664_s29 }
  0x60   : > { %s666_s30 = scalar_lea.vmem %s665_s29, 256  ;;  %p667_p9 = scmp.lt.s32.totalorder %s982_s26, %s665_s29 }
  0x61   : > { %vm238_vm2 = vcmp.ge.s32.totalorder %v214_v23, 1  ;;  %vm253_vm5 = vcmp.lt.s32.totalorder %v214_v23, 15  ;;  %p662_p6 = pnand %p661_p2, %p881_p13  ;;  %p668_p12 = scmp.lt.s32.totalorder %s666_s30, %s660_s27 }
  0x63   : > { %595 = vset.pattern.permute.xlu1 %v754_v5  ;;  %596 = vset.pattern.permute.xlu0 %v755_v6  ;;  %p663_p8 = pneg %p662_p6  ;;  %p669_p0 = por %p668_p12, %p667_p9 }
  0x64   : > { %329 = vperm.xlu1 %595, %v199_v2   ;;  %337 = vperm.xlu0 %596, %v199_v2  }
  0x65   : > { %p670_p5 = pnand %p669_p0, %p663_p8 }
  0x68   : > { %230 = vrot.lane.b32.xlu1 %v945_v7, %s756_s17  ;;  %245 = vrot.lane.b32.xlu0 %v945_v7, %s757_s19 }
  0x69   : > { %597 = vset.pattern.permute.xlu0 %v758_v9  ;;  %598 = vset.pattern.permute.xlu1 %v759_v10 }
  0x6c   : > { %232 = vrot.lane.b32.xlu1 %v951_v8, %s756_s17  ;;  %299 = vperm.xlu0 %597, %v199_v2  }
  0x70   : > { %247 = vrot.lane.b32.xlu1 %v951_v8, %s757_s19  ;;  %600 = vset.pattern.permute.xlu0 %v760_v11 }
  0x71   : > { %362 = vperm.xlu0 %600, %v199_v2  }
  0x74   : > { %305 = vperm.xlu1 %598, %v199_v2  }
  0x78   : > { %599 = vset.pattern.permute.xlu1 %v761_v12 }
  0x79   : > { %313 = vperm.xlu1 %599, %v199_v2  }
  0xd9   : > { %v277_v13 = vpop.permute.xlu1 %276  ;;  %v263_v15 = vpop.permute.xlu0 %262 }
  0xde   : > { %v324_v16 = vpop.permute.xlu1 %323  ;;  %v269_v18 = vpop.permute.xlu0 %268 }
  0xdf   : > { %v271_v34 = vmul.f32 %v269_v18, %v945_v7  ;;  %v272_v46 = vmul.f32 %v269_v18, %v951_v8 }
  0xe3   : > { %v330_v19 = vpop.permute.xlu1 %329  ;;  %v338_v24 = vpop.permute.xlu0 %337 }
  0xe4   : > { %v332_v35 = vmul.f32 %v330_v19, %v945_v7  ;;  %v333_v57 = vmul.f32 %v330_v19, %v951_v8 }
  0xe7   : > { %v231_v22 = vpop.permute.xlu1 %230  ;;  %v246_v29 = vpop.permute.xlu0 %245 }
  0xeb   : > { %v233_v25 = vpop.permute.xlu1 %232  ;;  %v300_v47 = vpop.permute.xlu0 %299 }
  0xec   : > { %v235_v26 = vsel %vm234_vm0, %v231_v22, %v233_v25  ;;  %v236_v27 = vsel %vm234_vm0, %v233_v25, %v231_v22 }
  0xed   : > { %v243_v28 = vsel %vm237_vm1, %v236_v27, 0.0  ;;  %v244_v30 = vsel %vm238_vm2, %v235_v26, 0.0 }
  0xee   : > { %v265_v31 = vmul.f32 %v263_v15, %v243_v28  ;;  %v326_v32 = vmul.f32 %v324_v16, %v243_v28  ;;  %v266_v38 = vmul.f32 %v263_v15, %v244_v30  ;;  %v327_v53 = vmul.f32 %v324_v16, %v244_v30 }
  0xef   : > { %v248_v33 = vpop.permute.xlu1 %247  ;;  %v302_v55 = vmul.f32 %v300_v47, %v243_v28  ;;  %v303_v56 = vmul.f32 %v300_v47, %v244_v30 }
  0xf0   : > { %v250_v36 = vsel %vm249_vm3, %v246_v29, %v248_v33  ;;  %v251_v37 = vsel %vm249_vm3, %v248_v33, %v246_v29  ;;  %v334_v43 = vadd.f32 %v332_v35, %v326_v32  ;;  %v273_v44 = vadd.f32 %v271_v34, %v265_v31  ;;  %v363_v6 = vpop.permute.xlu0 %362 }
  0xf1   : > { %v258_v39 = vsel %vm252_vm4, %v250_v36, 0.0  ;;  %v259_v40 = vsel %vm253_vm5, %v251_v37, 0.0  ;;  %v274_v54 = vadd.f32 %v272_v46, %v266_v38  ;;  %v335_v1 = vadd.f32 %v333_v57, %v327_v53 }
  0xf2   : > { %v279_v41 = vmul.f32 %v277_v13, %v258_v39  ;;  %v340_v42 = vmul.f32 %v338_v24, %v258_v39  ;;  %v280_v48 = vmul.f32 %v277_v13, %v259_v40  ;;  %v341_v58 = vmul.f32 %v338_v24, %v259_v40 }
  0xf3   : > { %v306_v45 = vpop.permute.xlu1 %305 }
  0xf4   : > { %v342_v49 = vadd.f32 %v340_v42, %v334_v43  ;;  %v281_v50 = vadd.f32 %v279_v41, %v273_v44  ;;  %v308_v51 = vmul.f32 %v306_v45, %v945_v7  ;;  %v309_v52 = vmul.f32 %v306_v45, %v951_v8 }
  0xf5   : > { %v282_v60 = vadd.f32 %v280_v48, %v274_v54  ;;  %v343_v4 = vadd.f32 %v341_v58, %v335_v1 }
  0xf6   : > { %344 = vrot.lane.b32.xlu0 %v342_v49, %s762_s21  ;;  %283 = vrot.lane.b32.xlu1 %v281_v50, %s763_s3  ;;  %v310_v61 = vadd.f32 %v308_v51, %v302_v55  ;;  %v311_v62 = vadd.f32 %v309_v52, %v303_v56 }
  0xf8   : > { %v314_v59 = vpop.permute.xlu1 %313 }
  0xf9   : > { %v316_v63 = vmul.f32 %v314_v59, %v258_v39  ;;  %v317_v0 = vmul.f32 %v314_v59, %v259_v40 }
  0xfa   : > { %285 = vrot.lane.b32.xlu1 %v282_v60, %s763_s3 }
  0xfb   : > { %v318_v2 = vadd.f32 %v316_v63, %v310_v61  ;;  %v319_v3 = vadd.f32 %v317_v0, %v311_v62 }
  0xfe   : > { %346 = vrot.lane.b32.xlu1 %v343_v4, %s762_s21 }
 0x168   : > { %v284_v5 = vpop.permute.xlu1 %283  ;;  %v345_v12 = vpop.permute.xlu0 %344 }
 0x16c   : > { %v286_v7 = vpop.permute.xlu1 %285 }
 0x16d   : > { %v289_v8 = vsel %vm287_vm6, %v286_v7, %v284_v5  ;;  %v288_v9 = vsel %vm287_vm6, %v284_v5, %v286_v7 }
 0x16e   : > { %v296_v10 = vsel %vm290_vm7, %v289_v8, 0.0  ;;  %v321_v14 = vadd.f32 %v319_v3, %v288_v9 }
 0x16f   : > { %v320_v11 = vadd.f32 %v318_v2, %v296_v10 }
 0x170   : > { %v347_v13 = vpop.permute.xlu1 %346 }
 0x171   : > { %v349_v15 = vsel %vm348_vm8, %v345_v12, %v347_v13  ;;  %v350_v16 = vsel %vm348_vm8, %v347_v13, %v345_v12 }
 0x172   : > { %v358_v18 = vsel %vm352_vm9, %v350_v16, 0.0  ;;  %v359_v19 = vadd.f32 %v349_v15, %v320_v11 }
 0x173   : > { %v360_v21 = vadd.f32 %v358_v18, %v321_v14 }
 0x174   : > { %v365_v22 = vadd.f32 %v363_v6, %v359_v19 }
 0x175   : > { %v366_v23 = vadd.f32 %v363_v6, %v360_v21 }
 0x177   : > { %v369_v17 = vcombine.low %v365_v22, %v366_v23 }
 0x179   : > { %371 = vst [vmem:[%s197_s5] sm:$0xff] %v369_v17 }
 0x17a   : > { %673 = shalt.err (!%p670_p5)
}
 0x17b   : > { %s674_s18 = scalar_lea.hbm %s980_s23, 128  ;;  %s678_s8 = scalar_lea.hbm %s1031_s2, 256 }
 0x17c   : > { %p675_p10 = scmp.ne.s32.totalorder %s980_s23, %s674_s18  ;;  %p679_p7 = scmp.lt.u32.totalorder %s980_s23, %s1031_s2 }
 0x17d   : > { %p680_p3 = scmp.lt.u32.totalorder %s678_s8, %s674_s18  ;;  %p682_p2 = scmp.lt.u32.totalorder %s674_s18, %s980_s23 }
 0x17e   : > { %p676_p4 = pnand %p675_p10, %p881_p13 }
 0x17f   : > { %p681_p11 = por %p680_p3, %p679_p7 }
 0x180   : > { %p677_p1 = pneg %p676_p4 }
 0x181   : > { %p683_p6 = por %p682_p2, %p681_p11 }
 0x183   : > { %p684_p8 = pnand %p683_p6, %p677_p1 }
 0x185   : > { %687 = shalt.err (!%p684_p8)
}
 0x186   : > { %510 = dma.vmem_to_hbm [thread:$0]  (%p881_p13), %s982_s26, 128, %s980_s23, %s373_s24  }
 0x187 PF: > { %s401_s21 = sand.u32 1, %s726_s9   ;;  %p1050_p9 = scmp.ne.s32.totalorder %s1039_s20, 0 }
 0x188   : > { %p1051_p12 = scmp.ge.s32.totalorder %s746_s14, 2  ;;  %s402_s3 = scalar_lea.sflag [#allocation4], %s401_s21 }
 0x18a   : > { %p521_p0 = pnand %p1051_p12, %p1050_p9 }
 0x18c   : > { %721 = dma.done.wait (!%p521_p0), %s402_s3, 128  }
 0x18d   : > { %723 = vsyncadd (!%p521_p0), %s402_s3, 4294967168  ;;  %s19_s14 = sadd.s32 1, %s746_s14   ;;  %s1052_s9 = smov %s730_s10 }
 0x18e   : > { %p16_p5 = scmp.ge.s32.totalorder %s19_s14, 4   ;;  %s1053_s10 = smov %s734_s11 }
 0x18f   : > { %s1054_s11 = smov %s889_s28  ;;  %s1055_s12 = smov %s742_s13 }
 0x190   : > { %s1056_s13 = smov %s1058_s25  ;;  %18 = sbr.rel (!%p16_p5) target bundleno = 7 (0x7), region = 78 }
 0x197   :  { %407 = vsyncpa [#allocation3], 1 }
 0x198   :  { %409 = vsyncpa [#allocation3 + $0x1], 1 }
 0x199   :  { %410 = vsyncpa [#allocation6], 1 }
 0x19a   :  { %411 = vsyncpa [#allocation4], 1 }
 0x19b   :  { %413 = vsyncpa [#allocation4 + $0x1], 1 }

</bundles_post_ra>
